<compile_context>
chip_gen: v7x
topology: tpu7x:2x2x1
jax: 0.10.0
libtpu: 0.0.40
codegen_flags: <defaults>
</compile_context>

<pallas_src>
import jax
import jax.numpy as jnp
from jax.experimental import pallas as pl
from jax.experimental.pallas import tpu as pltpu


# ---------------------------------------------------------------------------
# Small helpers
# ---------------------------------------------------------------------------
def _round_up(x, m):
    return (x + m - 1) // m * m


def _block_diag(blocks):
    n = len(blocks)
    r, c = blocks[0].shape
    out = jnp.zeros((n * r, n * c), blocks[0].dtype)
    for l, blk in enumerate(blocks):
        out = out.at[l * r:(l + 1) * r, l * c:(l + 1) * c].set(blk)
    return out


def _full_spec(shape):
    nd = len(shape)
    return pl.BlockSpec(shape, lambda i, _nd=nd: (0,) * _nd)


def _multi_tensorcore():
    """True on chips with 2 TensorCores per JAX device (v4/v5p/v7x)."""
    try:
        kind = jax.devices()[0].device_kind.lower()
    except Exception:
        return False
    single_tc = ("v2", "v3", "v5e", "v5 lite", "v5lite", "v6e", "v6 lite", "v6lite")
    return not any(s in kind for s in single_tc)


def _choose_tile_n(n_pad, cap, min_steps):
    """Largest multiple of 128 that divides n_pad, is <= cap, with >= min_steps."""
    m = n_pad // 128
    best = 1
    for d in range(1, m + 1):
        if m % d == 0 and 128 * d <= cap and (m // d) >= min_steps:
            best = d
    return 128 * best


# ---------------------------------------------------------------------------
# One-time weight fusion (hoisted out of the forward; cache the result)
# ---------------------------------------------------------------------------
def _fuse_stack(Ws, bs, *, fold_first_bias, mm_dtype, blockdiag_max_l):
    """Fuse the L per-net layers of one stack into one matrix per layer.

    Layer 0 (shared input): concat of W_l^T along rows -> (L*d1, d0) ; if
      fold_first_bias, the bias is appended as an extra column (the kernel
      input carries a ones row).
    Layer k>0: block-diagonal of the W_l^T (L <= blockdiag_max_l) or the
      stacked per-net (L, d_out, d_in) tensor (L > blockdiag_max_l).
    Returns (weight_arrays, metas, bias_segments); metas are
      (mode, per_net_in_dim, out_rows, bias_offset_placeholder).
    """
    L = Ws[0].shape[0]
    weight_arrays, metas, bias_segs = [], [], []
    for k, (W, b) in enumerate(zip(Ws, bs)):
        d_in, d_out = W.shape[1], W.shape[2]
        rows = L * d_out
        Wt = jnp.transpose(W, (0, 2, 1))                       # (L, d_out, d_in)
        if k == 0:
            Wf = Wt.reshape(rows, d_in)
            if fold_first_bias:
                Wf = jnp.concatenate([Wf, b.reshape(rows, 1)], axis=1)
                mode = "concat_fold"
            else:
                mode = "concat"
        elif L <= blockdiag_max_l:
            Wf = _block_diag([Wt[l] for l in range(L)])        # (rows, L*d_in)
            mode = "blockdiag"
        else:
            Wf = Wt                                            # (L, d_out, d_in)
            mode = "perblock"
        weight_arrays.append(Wf.astype(mm_dtype))
        metas.append([mode, d_in, rows, -1])
        if mode != "concat_fold":
            bias_segs.append(b.reshape(rows, 1).astype(jnp.float32))
    return weight_arrays, metas, bias_segs


def fuse_madps_params(params, *, mm_dtype=jnp.bfloat16, blockdiag_max_l=4):
    """One-time parameter fusion.  params = (s_Ws, s_bs, d_Ws, d_bs) with
    W_k: (L, d_in, d_out), b_k: (L, d_out) per layer."""
    s_Ws, s_bs, d_Ws, d_bs = params
    L = s_Ws[0].shape[0]
    assert s_Ws[-1].shape[-1] == d_Ws[0].shape[1], "shallow_dims[-1] must equal deep_dims[0]"

    ws_s, metas_s, segs_s = _fuse_stack(s_Ws, s_bs, fold_first_bias=True,
                                        mm_dtype=mm_dtype, blockdiag_max_l=blockdiag_max_l)
    ws_d, metas_d, segs_d = _fuse_stack(d_Ws, d_bs, fold_first_bias=False,
                                        mm_dtype=mm_dtype, blockdiag_max_l=blockdiag_max_l)

    # Pack all non-folded biases into one f32 array; sublane-aligned offsets.
    segs = iter(segs_s + segs_d)
    bias_parts, offset = [], 0
    for meta in metas_s + metas_d:
        if meta[0] == "concat_fold":
            continue
        seg = next(segs)
        rows = seg.shape[0]
        pad_rows = _round_up(rows, 8)
        if pad_rows != rows:
            seg = jnp.pad(seg, ((0, pad_rows - rows), (0, 0)))
        bias_parts.append(seg)
        meta[3] = offset
        offset += pad_rows
    bias_cat = (jnp.concatenate(bias_parts, axis=0) if bias_parts
                else jnp.zeros((8, 1), jnp.float32))

    return dict(
        weights=tuple(ws_s + ws_d),
        bias=bias_cat,
        metas_shallow=tuple(tuple(m) for m in metas_s),
        metas_deep=tuple(tuple(m) for m in metas_d),
        L=L,
        in_dim=s_Ws[0].shape[1],
        s_out=s_Ws[-1].shape[-1],
        out_dim=d_Ws[-1].shape[-1],
        mm_dtype=mm_dtype,
    )


# ---------------------------------------------------------------------------
# Kernel
# ---------------------------------------------------------------------------
def _make_kernel(metas_shallow, metas_deep, L, s_out, d_out, mm_dtype):
    n_s = len(metas_shallow)

    def kernel(idx_ref, x_ref, bias_ref, *refs):
        o_ref = refs[-1]
        w_refs = refs[:-1]
        ws_s = w_refs[:n_s]
        ws_d = w_refs[n_s:]

        idx = idx_ref[...]                      # (2, tn): row0=shallow, row1=deep
        idx_s = idx[0:1, :]
        idx_d = idx[1:2, :]

        def layer(h, w_ref, meta, relu):
            mode, d_in, rows, b_off = meta
            hq = h.astype(mm_dtype)
            if mode == "perblock":
                parts = [jnp.dot(w_ref[l], hq[l * d_in:(l + 1) * d_in, :],
                                 preferred_element_type=jnp.float32)
                         for l in range(L)]
                h = jnp.concatenate(parts, axis=0)
            else:
                # concat_fold / concat / blockdiag: one wide MXU push.
                h = jnp.dot(w_ref[...], hq, preferred_element_type=jnp.float32)
            if b_off >= 0:
                h = h + bias_ref[b_off:b_off + rows, :]
            if relu:
                h = jnp.maximum(h, 0.0)
            return h

        def run_stack(h, stack_refs, metas, final_relu):
            n = len(metas)
            for k in range(n):
                h = layer(h, stack_refs[k], metas[k], final_relu or k < n - 1)
            return h

        # Shallow stack (final ReLU), all L nets fused: (L*s_out, tn).
        hs = run_stack(x_ref[...], ws_s, metas_shallow, True)
        sel = hs[0:s_out, :]
        for l in range(1, L):
            sel = jnp.where(idx_s == l, hs[l * s_out:(l + 1) * s_out, :], sel)

        # Deep stack (no final activation), all L nets fused: (L*d_out, tn).
        hd = run_stack(sel, ws_d, metas_deep, False)
        out = hd[0:d_out, :]
        for l in range(1, L):
            out = jnp.where(idx_d == l, hd[l * d_out:(l + 1) * d_out, :], out)

        o_ref[...] = out.astype(o_ref.dtype)

    return kernel


# ---------------------------------------------------------------------------
# Forward
# ---------------------------------------------------------------------------
def madps_forward(fused, inputs, laac_shallow, laac_deep, *,
                  tile_n=None, return_transposed=False):
    """fused: output of fuse_madps_params.  inputs: list of A arrays (B, F).
    laac_shallow / laac_deep: (B, A) integer net selectors.
    Wrap in jax.jit for repeated calls to amortize dispatch/trace overhead."""
    L = fused["L"]
    F = fused["in_dim"]
    s_out = fused["s_out"]
    out_dim = fused["out_dim"]
    mm_dtype = fused["mm_dtype"]
    weights = fused["weights"]
    bias_cat = fused["bias"]

    x = jnp.stack(inputs)                       # (A, B, F)
    A, B, Fx = x.shape
    assert Fx == F, (Fx, F)
    N = A * B

    multi_tc = _multi_tensorcore()
    if tile_n is None:
        N_pad = _round_up(N, 128)
        cap = 2048 if multi_tc else 4096
        min_steps = 2 if (multi_tc and N_pad >= 256) else 1
        tile_n = _choose_tile_n(N_pad, cap, min_steps)
    else:
        tile_n = _round_up(max(int(tile_n), 128), 128)
        N_pad = _round_up(N, tile_n)

    # Row index on the lane axis: activations are (feature, row).  A constant
    # ones row is appended so the shallow layer-0 bias folds into its matmul.
    xT = x.reshape(N, F).T
    xT = jnp.concatenate([xT, jnp.ones((1, N), xT.dtype)], axis=0)   # (F+1, N)
    xT = jnp.pad(xT, ((0, 0), (0, N_pad - N))).astype(mm_dtype)

    idx = jnp.stack([laac_shallow.T.reshape(N),
                     laac_deep.T.reshape(N)]).astype(jnp.int32)      # (2, N)
    idx = jnp.pad(idx, ((0, 0), (0, N_pad - N)))

    grid = (N_pad // tile_n,)
    in_specs = ([pl.BlockSpec((2, tile_n), lambda i: (0, i)),
                 pl.BlockSpec((F + 1, tile_n), lambda i: (0, i)),
                 _full_spec(bias_cat.shape)]
                + [_full_spec(w.shape) for w in weights])
    out_spec = pl.BlockSpec((out_dim, tile_n), lambda i: (0, i))

    kernel = _make_kernel(fused["metas_shallow"], fused["metas_deep"],
                          L, s_out, out_dim, mm_dtype)
    outT = pl.pallas_call(
        kernel,
        out_shape=jax.ShapeDtypeStruct((out_dim, N_pad), jnp.float32),
        grid=grid,
        in_specs=in_specs,
        out_specs=out_spec,
        compiler_params=pltpu.CompilerParams(
            dimension_semantics=("parallel",)),
    )(idx, xT, bias_cat, *weights)

    if return_transposed:
        return outT[:, :N]                       # lane-dense (out_dim, A*B) slab
    out = outT[:, :N].T.reshape(A, B, out_dim)   # back to row-major layout
    return [out[a] for a in range(A)]            # list of A tensors (B, out_dim)


# ---------------------------------------------------------------------------
# Pure-JAX reference (mirrors the PyTorch forward, 2-D input branch)
# ---------------------------------------------------------------------------
def ref_forward(params, inputs, laac_shallow, laac_deep):
    s_Ws, s_bs, d_Ws, d_bs = params
    L = s_Ws[0].shape[0]
    x = jnp.stack(inputs)                  # (A, B, F)

    def run_mlp(h, Ws, bs, net, final_relu):
        n = len(Ws)
        for k in range(n):
            h = jnp.dot(h, Ws[k][net], precision=jax.lax.Precision.HIGHEST) + bs[k][net]
            if final_relu or k < n - 1:
                h = jax.nn.relu(h)
        return h

    shallow_outs = jnp.stack([run_mlp(x, s_Ws, s_bs, l, True) for l in range(L)])
    idx_s = laac_shallow.T                 # (A, B)
    sel = shallow_outs[0]
    for l in range(1, L):
        sel = jnp.where((idx_s == l)[:, :, None], shallow_outs[l], sel)

    deep_outs = jnp.stack([run_mlp(sel, d_Ws, d_bs, l, False) for l in range(L)])
    idx_d = laac_deep.T
    out = deep_outs[0]
    for l in range(1, L):
        out = jnp.where((idx_d == l)[:, :, None], deep_outs[l], out)
    return [out[a] for a in range(x.shape[0])]


# ---------------------------------------------------------------------------
# Demo / self-test
# ---------------------------------------------------------------------------
if __name__ == "__main__":
    key = jax.random.PRNGKey(0)

    # Deterministic parameter init, stacked per-net: W (L, in, out), b (L, out).
    # NOTE: PyTorch __init__ seeds every net identically; here nets get distinct
    # deterministic weights so the laac gather is observable -- forward
    # semantics are unchanged.
    def init_stack(key, dims, L):
        Ws, bs = [], []
        for k in range(len(dims) - 1):
            key, k1, k2 = jax.random.split(key, 3)
            Ws.append(jax.random.normal(k1, (L, dims[k], dims[k + 1]), jnp.float32)
                      / jnp.sqrt(float(dims[k])))
            bs.append(0.01 * jax.random.normal(k2, (L, dims[k + 1]), jnp.float32))
        return key, Ws, bs

    def make_problem(key, input_size, shallow_dims, deep_dims, L, A, B):
        key, s_Ws, s_bs = init_stack(key, [input_size] + shallow_dims, L)
        key, d_Ws, d_bs = init_stack(key, deep_dims, L)
        params = (s_Ws, s_bs, d_Ws, d_bs)
        key, k_in, k_ls, k_ld = jax.random.split(key, 4)
        inputs = [jax.random.normal(jax.random.fold_in(k_in, a),
                                    (B, input_size), jnp.float32) for a in range(A)]
        laac_shallow = jax.random.randint(k_ls, (B, A), 0, L)
        laac_deep = jax.random.randint(k_ld, (B, A), 0, L)
        return key, params, inputs, laac_shallow, laac_deep

    def check(outs, refs, atol, rtol, tag):
        for o, r in zip(outs, refs):
            o = jax.block_until_ready(o)
            assert o.shape == r.shape, (tag, o.shape, r.shape)
            if not jnp.allclose(o, r, atol=atol, rtol=rtol):
                raise AssertionError((tag, float(jnp.max(jnp.abs(o - r)))))

    # --- Case 1: laac_size = 2 (block-diagonal fusion path) ---------------
    key, params, inputs, ls, ld = make_problem(
        key, 16, [32, 32], [32, 64, 8], L=2, A=2, B=256)
    refs = ref_forward(params, inputs, ls, ld)

    fused_f32 = fuse_madps_params(params, mm_dtype=jnp.float32)
    check(madps_forward(fused_f32, inputs, ls, ld), refs, 5e-3, 5e-3, "L2/f32")

    fused_bf16 = fuse_madps_params(params)          # default: bf16 MXU operands
    check(madps_forward(fused_bf16, inputs, ls, ld), refs, 2e-1, 2e-1, "L2/bf16")

    # --- Case 2: laac_size = 5 (> 4 -> per-net matmul path for k>0) -------
    key, params5, inputs5, ls5, ld5 = make_problem(
        key, 8, [16, 16], [16, 16, 8], L=5, A=3, B=64)
    refs5 = ref_forward(params5, inputs5, ls5, ld5)
    fused5 = fuse_madps_params(params5, mm_dtype=jnp.float32)
    check(madps_forward(fused5, inputs5, ls5, ld5), refs5, 5e-3, 5e-3, "L5/f32")

    print("KERNEL_OK")
</pallas_src>

<mosaic_0001>
module attributes {stable_mosaic.version = 11 : i64} {
  func.func @kernel(%arg0: i32, %arg1: memref<2x256xi32, #tpu.memory_space<vmem>>, %arg2: memref<17x256xf32, #tpu.memory_space<vmem>>, %arg3: memref<208x1xf32, #tpu.memory_space<vmem>>, %arg4: memref<64x17xf32, #tpu.memory_space<vmem>>, %arg5: memref<64x64xf32, #tpu.memory_space<vmem>>, %arg6: memref<128x32xf32, #tpu.memory_space<vmem>>, %arg7: memref<16x128xf32, #tpu.memory_space<vmem>>, %arg8: memref<8x256xf32, #tpu.memory_space<vmem>>) attributes {dimension_semantics = [#tpu.dimension_semantics<parallel>], iteration_bounds = array<i64: 2>, scalar_prefetch = 0 : i64, scratch_operands = 0 : i64, tpu.core_type = #tpu.core_type<tc>, window_params = [{transform_indices = @transform_0, window_bounds = array<i64: 2, 256>}, {transform_indices = @transform_1, window_bounds = array<i64: 17, 256>}, {pipeline_mode = #tpu.pipeline_mode<synchronous>, transform_indices = @transform_2, window_bounds = array<i64: 208, 1>}, {pipeline_mode = #tpu.pipeline_mode<synchronous>, transform_indices = @transform_3, window_bounds = array<i64: 64, 17>}, {pipeline_mode = #tpu.pipeline_mode<synchronous>, transform_indices = @transform_4, window_bounds = array<i64: 64, 64>}, {pipeline_mode = #tpu.pipeline_mode<synchronous>, transform_indices = @transform_5, window_bounds = array<i64: 128, 32>}, {pipeline_mode = #tpu.pipeline_mode<synchronous>, transform_indices = @transform_6, window_bounds = array<i64: 16, 128>}, {transform_indices = @transform_7, window_bounds = array<i64: 8, 256>}]} {
    %c0 = arith.constant 0 : index
    %c0_0 = arith.constant 0 : index
    %0 = vector.load %arg1[%c0, %c0_0] : memref<2x256xi32, #tpu.memory_space<vmem>>, vector<2x256xi32>
    %1 = vector.extract_strided_slice %0 {offsets = [0, 0], sizes = [1, 256], strides = [1, 1]} : vector<2x256xi32> to vector<1x256xi32>
    %2 = vector.extract_strided_slice %0 {offsets = [1, 0], sizes = [1, 256], strides = [1, 1]} : vector<2x256xi32> to vector<1x256xi32>
    %c0_1 = arith.constant 0 : index
    %c0_2 = arith.constant 0 : index
    %3 = vector.load %arg2[%c0_1, %c0_2] : memref<17x256xf32, #tpu.memory_space<vmem>>, vector<17x256xf32>
    %c0_3 = arith.constant 0 : index
    %c0_4 = arith.constant 0 : index
    %4 = vector.load %arg4[%c0_3, %c0_4] : memref<64x17xf32, #tpu.memory_space<vmem>>, vector<64x17xf32>
    %cst = arith.constant dense<0.000000e+00> : vector<64x256xf32>
    %5 = tpu.matmul %4, %3, %cst {dimension_numbers = #tpu.dot_dimension_numbers<[1], [0], [0], [1], [0, 0, 1, 1], [], []>} : vector<64x17xf32>, vector<17x256xf32>, vector<64x256xf32> -> vector<64x256xf32>
    %cst_5 = arith.constant 0.000000e+00 : f32
    %6 = vector.broadcast %cst_5 : f32 to vector<64x256xf32>
    %7 = arith.maximumf %5, %6 : vector<64x256xf32>
    %c0_6 = arith.constant 0 : index
    %c0_7 = arith.constant 0 : index
    %8 = vector.load %arg5[%c0_6, %c0_7] : memref<64x64xf32, #tpu.memory_space<vmem>>, vector<64x64xf32>
    %cst_8 = arith.constant dense<0.000000e+00> : vector<64x256xf32>
    %9 = tpu.matmul %8, %7, %cst_8 {dimension_numbers = #tpu.dot_dimension_numbers<[1], [0], [0], [1], [0, 0, 1, 1], [], []>} : vector<64x64xf32>, vector<64x256xf32>, vector<64x256xf32> -> vector<64x256xf32>
    %c0_9 = arith.constant 0 : index
    %c0_10 = arith.constant 0 : index
    %10 = vector.load %arg3[%c0_9, %c0_10] : memref<208x1xf32, #tpu.memory_space<vmem>>, vector<64x1xf32>
    %11 = vector.broadcast %10 : vector<64x1xf32> to vector<64x256xf32>
    %12 = arith.addf %9, %11 : vector<64x256xf32>
    %cst_11 = arith.constant 0.000000e+00 : f32
    %13 = vector.broadcast %cst_11 : f32 to vector<64x256xf32>
    %14 = arith.maximumf %12, %13 : vector<64x256xf32>
    %15 = vector.extract_strided_slice %14 {offsets = [0, 0], sizes = [32, 256], strides = [1, 1]} : vector<64x256xf32> to vector<32x256xf32>
    %c1_i32 = arith.constant 1 : i32
    %16 = vector.broadcast %c1_i32 : i32 to vector<1x256xi32>
    %17 = arith.cmpi eq, %1, %16 : vector<1x256xi32>
    %18 = vector.extract_strided_slice %14 {offsets = [32, 0], sizes = [32, 256], strides = [1, 1]} : vector<64x256xf32> to vector<32x256xf32>
    %19 = vector.shape_cast %17 : vector<1x256xi1> to vector<1x256xi1>
    %20 = vector.broadcast %19 : vector<1x256xi1> to vector<32x256xi1>
    %21 = arith.select %20, %18, %15 : vector<32x256xi1>, vector<32x256xf32>
    %c0_12 = arith.constant 0 : index
    %c0_13 = arith.constant 0 : index
    %22 = vector.load %arg6[%c0_12, %c0_13] : memref<128x32xf32, #tpu.memory_space<vmem>>, vector<128x32xf32>
    %cst_14 = arith.constant dense<0.000000e+00> : vector<128x256xf32>
    %23 = tpu.matmul %22, %21, %cst_14 {dimension_numbers = #tpu.dot_dimension_numbers<[1], [0], [0], [1], [0, 0, 1, 1], [], []>} : vector<128x32xf32>, vector<32x256xf32>, vector<128x256xf32> -> vector<128x256xf32>
    %c64 = arith.constant 64 : index
    %c0_15 = arith.constant 0 : index
    %24 = vector.load %arg3[%c64, %c0_15] : memref<208x1xf32, #tpu.memory_space<vmem>>, vector<128x1xf32>
    %25 = vector.broadcast %24 : vector<128x1xf32> to vector<128x256xf32>
    %26 = arith.addf %23, %25 : vector<128x256xf32>
    %cst_16 = arith.constant 0.000000e+00 : f32
    %27 = vector.broadcast %cst_16 : f32 to vector<128x256xf32>
    %28 = arith.maximumf %26, %27 : vector<128x256xf32>
    %c0_17 = arith.constant 0 : index
    %c0_18 = arith.constant 0 : index
    %29 = vector.load %arg7[%c0_17, %c0_18] : memref<16x128xf32, #tpu.memory_space<vmem>>, vector<16x128xf32>
    %cst_19 = arith.constant dense<0.000000e+00> : vector<16x256xf32>
    %30 = tpu.matmul %29, %28, %cst_19 {dimension_numbers = #tpu.dot_dimension_numbers<[1], [0], [0], [1], [0, 0, 1, 1], [], []>} : vector<16x128xf32>, vector<128x256xf32>, vector<16x256xf32> -> vector<16x256xf32>
    %c192 = arith.constant 192 : index
    %c0_20 = arith.constant 0 : index
    %31 = vector.load %arg3[%c192, %c0_20] : memref<208x1xf32, #tpu.memory_space<vmem>>, vector<16x1xf32>
    %32 = vector.broadcast %31 : vector<16x1xf32> to vector<16x256xf32>
    %33 = arith.addf %30, %32 : vector<16x256xf32>
    %34 = vector.extract_strided_slice %33 {offsets = [0, 0], sizes = [8, 256], strides = [1, 1]} : vector<16x256xf32> to vector<8x256xf32>
    %c1_i32_21 = arith.constant 1 : i32
    %35 = vector.broadcast %c1_i32_21 : i32 to vector<1x256xi32>
    %36 = arith.cmpi eq, %2, %35 : vector<1x256xi32>
    %37 = vector.extract_strided_slice %33 {offsets = [8, 0], sizes = [8, 256], strides = [1, 1]} : vector<16x256xf32> to vector<8x256xf32>
    %38 = vector.shape_cast %36 : vector<1x256xi1> to vector<1x256xi1>
    %39 = vector.broadcast %38 : vector<1x256xi1> to vector<8x256xi1>
    %40 = arith.select %39, %37, %34 : vector<8x256xi1>, vector<8x256xf32>
    %c0_22 = arith.constant 0 : index
    %c0_23 = arith.constant 0 : index
    %41 = vector.load %arg8[%c0_22, %c0_23] : memref<8x256xf32, #tpu.memory_space<vmem>>, vector<8x256xf32>
    tpu.vector_store %arg8[%c0_22, %c0_23], %40 {strides = array<i32>} : memref<8x256xf32, #tpu.memory_space<vmem>>, vector<8x256xf32>,
    return
  }
  func.func @transform_0(%arg0: i32) -> (i32, i32) {
    %c0_i32 = arith.constant 0 : i32
    %c0_i32_0 = arith.constant 0 : i32
    return %c0_i32, %arg0 : i32, i32
  }
  func.func @transform_1(%arg0: i32) -> (i32, i32) {
    %c0_i32 = arith.constant 0 : i32
    %c0_i32_0 = arith.constant 0 : i32
    return %c0_i32, %arg0 : i32, i32
  }
  func.func @transform_2(%arg0: i32) -> (i32, i32) {
    %c0_i32 = arith.constant 0 : i32
    %c0_i32_0 = arith.constant 0 : i32
    %c0_i32_1 = arith.constant 0 : i32
    return %c0_i32, %c0_i32_0 : i32, i32
  }
  func.func @transform_3(%arg0: i32) -> (i32, i32) {
    %c0_i32 = arith.constant 0 : i32
    %c0_i32_0 = arith.constant 0 : i32
    %c0_i32_1 = arith.constant 0 : i32
    return %c0_i32, %c0_i32_0 : i32, i32
  }
  func.func @transform_4(%arg0: i32) -> (i32, i32) {
    %c0_i32 = arith.constant 0 : i32
    %c0_i32_0 = arith.constant 0 : i32
    %c0_i32_1 = arith.constant 0 : i32
    return %c0_i32, %c0_i32_0 : i32, i32
  }
  func.func @transform_5(%arg0: i32) -> (i32, i32) {
    %c0_i32 = arith.constant 0 : i32
    %c0_i32_0 = arith.constant 0 : i32
    %c0_i32_1 = arith.constant 0 : i32
    return %c0_i32, %c0_i32_0 : i32, i32
  }
  func.func @transform_6(%arg0: i32) -> (i32, i32) {
    %c0_i32 = arith.constant 0 : i32
    %c0_i32_0 = arith.constant 0 : i32
    %c0_i32_1 = arith.constant 0 : i32
    return %c0_i32, %c0_i32_0 : i32, i32
  }
  func.func @transform_7(%arg0: i32) -> (i32, i32) {
    %c0_i32 = arith.constant 0 : i32
    %c0_i32_0 = arith.constant 0 : i32
    return %c0_i32, %arg0 : i32, i32
  }
}

</mosaic_0001>

<bundles_post_ra>
// kernel: tpu_custom_call.1
= control target key start
LH: loop header
LB: loop body
LE: loop exit
PB: predicated region body
PF: predicated region fallthrough
CT: control target
= control target key end

     0   :  { %12 = vsyncpa [#allocation4], 0  ;;  %s1973_s0 = inlined_call_operand.vmem [shape: s32[2,512], index: 0, kind: input, shape index: {}]   ;;  %s1974_s1 = inlined_call_operand.vmem [shape: f32[17,512], index: 1, kind: input, shape index: {}]   ;;  %s1975_s2 = inlined_call_operand.vmem [shape: f32[208,1], index: 2, kind: input, shape index: {}]   ;;  %s1976_s3 = inlined_call_operand.vmem [shape: f32[64,17], index: 3, kind: input, shape index: {}]   ;;  %s1977_s4 = inlined_call_operand.vmem [shape: f32[64,64], index: 4, kind: input, shape index: {}]   ;;  %s1978_s5 = inlined_call_operand.vmem [shape: f32[128,32], index: 5, kind: input, shape index: {}]   ;;  %s1979_s6 = inlined_call_operand.vmem [shape: f32[16,128], index: 6, kind: input, shape index: {}]   ;;  %s1980_s7 = inlined_call_operand.hbm [shape: f32[8,512], index: 7, kind: output, shape index: {}]  }
   0x1   :  { %14 = vsyncpa [#allocation4 + $0x1], 0  ;;  %s1582_s24 = smov 0   ;;  %s1584_s25 = smov 0  }
   0x2   :  { %s1586_s26 = smov 0   ;;  %s1588_s27 = smov 0  }
   0x3 LB: > { %s1603_s28 = sadd.s32 4294967295, %s1537_s27   ;;  %s1304_s29 = sadd.s32 4294967294, %s1537_s27   ;;  %s1537_s27 = sphi %s1588_s27, %s1988_s27   ;;  %s1533_s26 = sphi %s1586_s26, %s1987_s26   ;;  %s1529_s25 = sphi %s1584_s25, %s1986_s25   ;;  %s1525_s24 = sphi %s1582_s24, %s1985_s24  }
   0x4   : > { %s1607_s30 = sadd.s32 1, %s1537_s27   ;;  %s53_s8 = sadd.s32 1, %s1533_s26 }
   0x5   : > { %s50_s9 = ssub.s32 %s1537_s27, %s1607_s30  ;;  %p60_p0 = scmp.ne.s32.totalorder %s1533_s26, %s1529_s25 }
   0x6   : > { %p51_p1 = scmp.eq.s32.totalorder %s50_s9, 0  ;;  %p61_p2 = scmp.eq.s32.totalorder %s1537_s27, 0 }
   0x7   : > { %p195_p3 = scmp.eq.s32.totalorder %s1603_s28, 1  ;;  %p200_p4 = scmp.ne.s32.totalorder %s1529_s25, %s1525_s24 }
   0x8   : > { %s1619_s10 = scalar_select %p51_p1, %s1533_s26, %s53_s8  }
   0x9   : > { %p62_p5 = por %p61_p2, %p60_p0  ;;  %p1621_p6 = por %p195_p3, %p60_p0 }
   0xa   : > { %p201_p7 = scmp.eq.s32.totalorder %s1304_s29, 1  ;;  %p1306_p9 = scmp.ge.s32.totalorder %s1537_s27, 2 }
   0xc   : > { %p1625_p8 = por %p201_p7, %p200_p4  ;;  %232 = sbr.rel (%p1306_p9) target bundleno = 26 (0x1a), region = 36 }
  0x13   : > { %244 = sbr.rel (!%p62_p5) target bundleno = 26 (0x1a), region = 44  ;;  %s246_s13 = sand.u32 (%p62_p5), 1, %s1533_s26  }
  0x14   : > { %s1352_s14 = sshll.u32 (%p62_p5), %s1537_s27, 4  ;;  %s1430_s15 = smul.u32 (%p62_p5), 48, %s246_s13 }
  0x15   : > { %s251_s18 = scalar_lea.vmem (%p62_p5), %s1974_s1, %s1352_s14 }
  0x16   : > { %v264_v0 = vld [vmem:[%s251_s18] sm:$0xff] (%p62_p5)  ;;  %v266_v1 = vld [vmem:[%s251_s18 + $0x8] sm:$0xff] (%p62_p5)  ;;  %s248_s19 = scalar_lea.vmem (%p62_p5), [#allocation2], %s1430_s15 }
  0x17   : > { %v268_v2 = vld [vmem:[%s251_s18 + $0x20] sm:$0xff] (%p62_p5)  ;;  %v270_v3 = vld [vmem:[%s251_s18 + $0x28] sm:$0xff] (%p62_p5)  ;;  %265 = vst [vmem:[%s248_s19] sm:$0xff] (%p62_p5), %v264_v0  ;;  %267 = vst [vmem:[%s248_s19 + $0x8] sm:$0xff] (%p62_p5), %v266_v1 }
  0x18   : > { %v272_v4 = vld [vmem:[%s251_s18 + $0x40] sm:$0xff] (%p62_p5)  ;;  %v274_v5 = vld [vmem:[%s251_s18 + $0x48] sm:$0xff] (%p62_p5)  ;;  %269 = vst [vmem:[%s248_s19 + $0x10] sm:$0xff] (%p62_p5), %v268_v2  ;;  %271 = vst [vmem:[%s248_s19 + $0x18] sm:$0xff] (%p62_p5), %v270_v3 }
  0x19   : > { %273 = vst [vmem:[%s248_s19 + $0x20] sm:$0xff] (%p62_p5), %v272_v4  ;;  %275 = vst [vmem:[%s248_s19 + $0x28] sm:$0xff] (%p62_p5), %v274_v5 }
  0x1a PF: > { %p1309_p10 = scmp.ge.s32.totalorder %s1537_s27, 1  ;;  %p280_p11 = scmp.lt.s32.totalorder %s1537_s27, 3 }
  0x1c   : > { %p281_p12 = pnand %p1309_p10, %p280_p11 }
  0x1d   : > { %s1640_s20 = sand.u32 (!%p281_p12), 1, %s1529_s25   ;;  %v1539_v6 = vmov (!%p281_p12), 0.0   ;;  %vm371_vm0 = vcmask (!%p281_p12), 1040384   ;;  %v338_v15 = vld [vmem:[%s1976_s3] sm:$0xff] (!%p281_p12)  ;;  %vm346_vm1 = vcmask (!%p281_p12), 138240   ;;  %v339_v16 = vld [vmem:[%s1976_s3 + $0x8] sm:$0xff] (!%p281_p12) }
  0x1e   : > { %284 = sbr.rel (%p281_p12) target bundleno = 1057 (0x421), region = 67  ;;  %442 = vmatprep.mubr.f32.mxu1 (!%p281_p12), %v1539_v6  ;;  %970 = vmatprep.mubr.f32.mxu0 (!%p281_p12), %v1539_v6  ;;  %v340_v17 = vld [vmem:[%s1976_s3 + $0x10] sm:$0xff] (!%p281_p12)  ;;  %v341_v18 = vld [vmem:[%s1976_s3 + $0x18] sm:$0xff] (!%p281_p12)  ;;  %v342_v19 = vld [vmem:[%s1976_s3 + $0x20] sm:$0xff] (!%p281_p12)  ;;  %v1540_v25 = vmov (!%p281_p12), 0   ;;  %vm563_vm2 = vcmask (!%p281_p12), 523264  }
  0x1f   : > { %s1431_s21 = smul.u32 (!%p281_p12), 48, %s1640_s20  ;;  %v343_v20 = vld [vmem:[%s1976_s3 + $0x28] sm:$0xff] (!%p281_p12)  ;;  %v344_v21 = vld [vmem:[%s1976_s3 + $0x30] sm:$0xff] (!%p281_p12)  ;;  %v345_v22 = vld [vmem:[%s1976_s3 + $0x38] sm:$0xff] (!%p281_p12)  ;;  %1474 = vset.pattern.permute.xlu1 (!%p281_p12), %v1540_v25  ;;  %1473 = vset.pattern.permute.xlu0 (!%p281_p12), %v1540_v25  ;;  %s1311_s15 = sshll.u32 (!%p281_p12), %s1603_s28, 1  ;;  %vm857_vm6 = vcmask (!%p281_p12), 261120  }
  0x20   : > { %v519_v23 = vld [vmem:[%s1975_s2 + $0x20] sm:$0xff] (!%p281_p12)  ;;  %v520_v26 = vld [vmem:[%s1975_s2 + $0x28] sm:$0xff] (!%p281_p12)  ;;  %v518_v28 = vld [vmem:[%s1975_s2 + $0x18] sm:$0xff] (!%p281_p12)  ;;  %p324_p13 = scmp.lt.s32.totalorder (!%p281_p12), %s1311_s15, 3  ;;  %s1310_s17 = sshll.u32 (!%p281_p12), %s1640_s20, 4 }
  0x21   : > { %s289_s22 = scalar_lea.vmem (!%p281_p12), [#allocation2], %s1431_s21  ;;  %v515_v24 = vld [vmem:[%s1975_s2] sm:$0xff] (!%p281_p12)  ;;  %545 = vperm.xlu1 (!%p281_p12), %1474, %v519_v23   ;;  %v516_v27 = vld [vmem:[%s1975_s2 + $0x8] sm:$0xff] (!%p281_p12)  ;;  %v517_v29 = vld [vmem:[%s1975_s2 + $0x10] sm:$0xff] (!%p281_p12)  ;;  %s1353_s18 = sshll.u32 (!%p281_p12), %s1603_s28, 8 }
  0x22   : > { %v333_v7 = vld [vmem:[%s289_s22 + $0x8] sm:$0xff] (!%p281_p12)  ;;  %v335_v8 = vld [vmem:[%s289_s22 + $0x18] sm:$0xff] (!%p281_p12)  ;;  %v332_v9 = vld [vmem:[%s289_s22] sm:$0xff] (!%p281_p12)  ;;  %525 = vperm.xlu0 (!%p281_p12), %1473, %v515_v24   ;;  %s1929_s29 = scalar_lea.hbm (!%p281_p12), %s1980_s7, %s1353_s18  ;;  %s1213_s28 = scalar_lea.sflag (!%p281_p12), [#allocation4], %s1640_s20 }
  0x23   : > { %v1354_v10 = vpack.c.bf16 (!%p281_p12), %v335_v8, %v333_v7  ;;  %v334_v11 = vld [vmem:[%s289_s22 + $0x10] sm:$0xff] (!%p281_p12)  ;;  %v337_v13 = vld [vmem:[%s289_s22 + $0x28] sm:$0x1] (!%p281_p12)  ;;  %v336_v14 = vld [vmem:[%s289_s22 + $0x20] sm:$0x1] (!%p281_p12)  ;;  %s1541_s9 = smov (!%p281_p12), [#allocation3]  }
  0x24   : > { %v1356_v12 = vpack.c.bf16 (!%p281_p12), %v334_v11, %v332_v9  ;;  %v522_v30 = vld [vmem:[%s1975_s2 + $0x38] sm:$0xff] (!%p281_p12)  ;;  %v521_v31 = vld [vmem:[%s1975_s2 + $0x30] sm:$0xff] (!%p281_p12)  ;;  %v762_v32 = vld [vmem:[%s1975_s2 + $0x48] sm:$0xff] (!%p281_p12)  ;;  %s1479_s13 = sshll.u32 (!%p281_p12), %s1541_s9, 4  ;;  %s1480_s13 = int_to_ptr.vmem [resolvable:$false] %s1479_s13 }
  0x25   : > { %1355 = vmatprep.subr.bf16.mxu1 %v1354_v10  ;;  %550 = vperm.xlu1 %1474, %v520_v26   ;;  %v761_v33 = vld [vmem:[%s1975_s2 + $0x40] sm:$0xff]  ;;  %v764_v34 = vld [vmem:[%s1975_s2 + $0x58] sm:$0xff]  ;;  %v763_v35 = vld [vmem:[%s1975_s2 + $0x50] sm:$0xff]  ;;  %s1990_s15 = smov (!%p324_p13, %s1311_s15), 3  ;;  %s1481_s14 = scalar_lea.vmem %s1480_s13, 512 }
  0x26   : > { %1357 = vmatpush1.bf16.msra.mxu1 %v1356_v12  ;;  %530 = vperm.xlu0 %1473, %v516_v27   ;;  %v766_v36 = vld [vmem:[%s1975_s2 + $0x68] sm:$0xff]  ;;  %v765_v37 = vld [vmem:[%s1975_s2 + $0x60] sm:$0xff]  ;;  %v768_v38 = vld [vmem:[%s1975_s2 + $0x78] sm:$0xff]  ;;  %s1312_s16 = sshll.u32 %s1990_s15, 1 }
  0x27   : > { %1313 = vmatprep.subr.msk.mxu1 %vm371_vm0, %v337_v13  ;;  %v767_v39 = vld [vmem:[%s1975_s2 + $0x70] sm:$0xff]  ;;  %v770_v40 = vld [vmem:[%s1975_s2 + $0x88] sm:$0xff]  ;;  %v769_v41 = vld [vmem:[%s1975_s2 + $0x80] sm:$0xff]  ;;  %s327_s19 = scalar_lea.vmem %s1973_s0, %s1312_s16 }
  0x28   : > { %v772_v42 = vld [vmem:[%s1975_s2 + $0x98] sm:$0xff]  ;;  %v771_v43 = vld [vmem:[%s1975_s2 + $0x90] sm:$0xff]  ;;  %v774_v44 = vld [vmem:[%s1975_s2 + $0xa8] sm:$0xff] }
  0x29   : > { %540 = vperm.xlu1 %1474, %v518_v28   ;;  %v773_v45 = vld [vmem:[%s1975_s2 + $0xa0] sm:$0xff]  ;;  %v776_v46 = vld [vmem:[%s1975_s2 + $0xb8] sm:$0xff]  ;;  %v775_v47 = vld [vmem:[%s1975_s2 + $0xb0] sm:$0xff] }
  0x2a   : > { %1314 = vmatpush1.msk.msra.mxu1 %vm371_vm0, %v336_v14  ;;  %535 = vperm.xlu0 %1473, %v517_v29   ;;  %v1102_v48 = vld [vmem:[%s1975_s2 + $0xc8] sm:$0xff]  ;;  %v1101_v49 = vld [vmem:[%s1975_s2 + $0xc0] sm:$0xff] }
  0x2b   : > { %1315 = vmatmul.mubr.msk.f32.vlgmr.msra.gmra.mrb[0].mxu1 %vm346_vm1, %v338_v15  ;;  %v507_v28 = vld [vmem:[%s1977_s4] sm:$0xff]  ;;  %v508_v29 = vld [vmem:[%s1977_s4 + $0x8] sm:$0xff] }
  0x2c   : > { %448 = vmatprep.mubr.f32.mxu1 %v1539_v6 }
  0x2d   : > { %560 = vperm.xlu1 %1474, %v522_v30   ;;  %v509_v30 = vld [vmem:[%s1977_s4 + $0x10] sm:$0xff] }
  0x2e   : > { %555 = vperm.xlu0 %1473, %v521_v31   ;;  %v510_v31 = vld [vmem:[%s1977_s4 + $0x18] sm:$0xff] }
  0x2f   : > { %1316 = vmatmul.mubr.msk.f32.gmra.mrb[2].mxu1 %vm346_vm1, %v339_v16 }
  0x30   : > { %454 = vmatprep.mubr.f32.mxu1 %v1539_v6 }
  0x31   : > { %784 = vperm.xlu1 %1474, %v762_v32   ;;  %v511_v32 = vld [vmem:[%s1977_s4 + $0x20] sm:$0xff] }
  0x32   : > { %779 = vperm.xlu0 %1473, %v761_v33   ;;  %v512_v33 = vld [vmem:[%s1977_s4 + $0x28] sm:$0xff] }
  0x33   : > { %1317 = vmatmul.mubr.msk.f32.gmra.mrb[4].mxu1 %vm346_vm1, %v340_v17 }
  0x34   : > { %460 = vmatprep.mubr.f32.mxu1 %v1539_v6 }
  0x35   : > { %794 = vperm.xlu1 %1474, %v764_v34   ;;  %v513_v34 = vld [vmem:[%s1977_s4 + $0x30] sm:$0xff] }
  0x36   : > { %789 = vperm.xlu0 %1473, %v763_v35   ;;  %v514_v35 = vld [vmem:[%s1977_s4 + $0x38] sm:$0xff] }
  0x37   : > { %1318 = vmatmul.mubr.msk.f32.gmra.mrb[6].mxu1 %vm346_vm1, %v341_v18 }
  0x38   : > { %466 = vmatprep.mubr.f32.mxu1 %v1539_v6 }
  0x39   : > { %804 = vperm.xlu1 %1474, %v766_v36   ;;  %v719_v36 = vlaneseq }
  0x3a   : > { %799 = vperm.xlu0 %1473, %v765_v37  }
  0x3b   : > { %1319 = vmatmul.mubr.msk.f32.gmra.mrb[8].mxu1 %vm346_vm1, %v342_v19 }
  0x3c   : > { %472 = vmatprep.mubr.f32.mxu1 %v1539_v6 }
  0x3d   : > { %814 = vperm.xlu1 %1474, %v768_v38   ;;  %v331_v38 = vld [vmem:[%s327_s19] sm:$0xf]  ;;  %s322_s19 = scalar_lea.vmem [#allocation3], %s1310_s17 }
  0x3e   : > { %809 = vperm.xlu0 %1473, %v767_v39   ;;  %vm717_vm3 = vcmp.eq.s32.totalorder %v331_v38, 1  ;;  %s1227_s21 = sshll.u32 %s322_s19, 4  ;;  %s1931_s21 = int_to_ptr.vmem [resolvable:$true] %s1227_s21 }
  0x3f   : > { %1320 = vmatmul.mubr.msk.f32.gmra.mrb[10].mxu1 %vm346_vm1, %v343_v20  ;;  %s1475_s8 = scalar_lea.vmem %s1931_s21, 256  ;;  %p1482_p3 = scmp.lt.s32.totalorder %s1931_s21, %s1480_s13 }
  0x40   : > { %478 = vmatprep.mubr.f32.mxu1 %v1539_v6  ;;  %p1476_p0 = scmp.ne.s32.totalorder %s1931_s21, %s1475_s8  ;;  %p1483_p4 = scmp.lt.s32.totalorder %s1481_s14, %s1475_s8 }
  0x41   : > { %824 = vperm.xlu1 %1474, %v770_v40   ;;  %v1809_v40 = vshrl.u32 %v719_v36, 7 }
  0x42   : > { %819 = vperm.xlu0 %1473, %v769_v41   ;;  %p1477_p1 = pnand %p1476_p0, %p1621_p6  ;;  %p1484_p5 = por %p1483_p4, %p1482_p3 }
  0x43   : > { %1321 = vmatmul.mubr.msk.f32.gmra.mrb[12].mxu1 %vm346_vm1, %v344_v21 }
  0x44   : > { %484 = vmatprep.mubr.f32.mxu1 %v1539_v6  ;;  %p1478_p2 = pneg %p1477_p1 }
  0x45   : > { %834 = vperm.xlu1 %1474, %v772_v42  }
  0x46   : > { %829 = vperm.xlu0 %1473, %v771_v43   ;;  %v721_v43 = vsub.s32 0, %v1809_v40  ;;  %p1485_p7 = pnand %p1484_p5, %p1478_p2 }
  0x47   : > { %1322 = vmatmul.mubr.msk.f32.gmra.mrb[14].mxu1 %vm346_vm1, %v345_v22 }
  0x48   : > { %652 = vmatprep.mubr.f32.mxu1 %v1539_v6 }
  0x49   : > { %844 = vperm.xlu1 %1474, %v774_v44  }
  0x4a   : > { %839 = vperm.xlu0 %1473, %v773_v45   ;;  %v1813_v45 = vsel %vm717_vm3, 1, %v1540_v25 }
  0x4d   : > { %854 = vperm.xlu1 %1474, %v776_v46   ;;  %v725_v46 = vsub.s32 2, %v1809_v40 }
  0x4e   : > { %849 = vperm.xlu0 %1473, %v775_v47  }
  0x51   : > { %1110 = vperm.xlu1 %1474, %v1102_v48  }
  0x52   : > { %1105 = vperm.xlu0 %1473, %v1101_v49   ;;  %v722_v49 = vrot.slane %v1813_v45, %v721_v43 }
  0xa1   : > { %v526_v44 = vpop.permute.xlu0 %525 }
  0xfe   : > { %v444_v50 = vpop.f32.mrb[0].mxu1 }
  0xff   : > { %v446_v51 = vpop.f32.mrb[1].mxu1  ;;  %v491_v53 = vmax.f32 %v444_v50, 0.0  ;;  %v546_v50 = vpop.permute.xlu1 %545 }
 0x100   : > { %v492_v56 = vmax.f32 %v446_v51, 0.0  ;;  %v726_v51 = vrot.slane %v1813_v45, %v725_v46 }
 0x102   : > { %v450_v52 = vpop.f32.mrb[2].mxu1 }
 0x103   : > { %v493_v54 = vmax.f32 %v450_v52, 0.0  ;;  %v452_v55 = vpop.f32.mrb[3].mxu1  ;;  %v531_v52 = vpop.permute.xlu0 %530 }
 0x104   : > { %v494_v57 = vmax.f32 %v452_v55, 0.0  ;;  %v730_v55 = vrot.slane %v722_v49, %v721_v43 }
 0x105   : > { %v1360_v58 = vpack.c.bf16 %v493_v54, %v491_v53 }
 0x106   : > { %v1358_v59 = vpack.c.bf16 %v494_v57, %v492_v56  ;;  %v456_v60 = vpop.f32.mrb[4].mxu1  ;;  %v734_v57 = vrot.slane %v726_v51, %v721_v43  ;;  %vm735_vm4 = vcmp.eq.s32.totalorder %v730_v55, 1  ;;  %v746_v55 = vld [vmem:[%s1978_s5 + $0x8] sm:$0xff] }
 0x107   : > { %v458_v61 = vpop.f32.mrb[5].mxu1  ;;  %v495_v63 = vmax.f32 %v456_v60, 0.0 }
 0x108   : > { %1359 = vmatprep.subr.bf16.mxu1 %v1358_v59  ;;  %v496_v2 = vmax.f32 %v458_v61, 0.0  ;;  %vm1818_vm5 = vcmp.eq.s32.totalorder %v734_v57, 1  ;;  %v748_v57 = vld [vmem:[%s1978_s5 + $0x18] sm:$0xff] }
 0x109   : > { %1361 = vmatpush1.bf16.msra.mxu1 %v1360_v58  ;;  %v551_v58 = vpop.permute.xlu1 %550 }
 0x10a   : > { %v462_v62 = vpop.f32.mrb[6].mxu1 }
 0x10b   : > { %v497_v0 = vmax.f32 %v462_v62, 0.0  ;;  %v464_v1 = vpop.f32.mrb[7].mxu1  ;;  %v536_v62 = vpop.permute.xlu0 %535 }
 0x10c   : > { %v498_v3 = vmax.f32 %v464_v1, 0.0 }
 0x10d   : > { %v1364_v4 = vpack.c.bf16 %v497_v0, %v495_v63 }
 0x10e   : > { %v1362_v5 = vpack.c.bf16 %v498_v3, %v496_v2  ;;  %v468_v7 = vpop.f32.mrb[8].mxu1  ;;  %v759_v3 = vld [vmem:[%s1978_s5 + $0x70] sm:$0xff] }
 0x10f   : > { %v470_v8 = vpop.f32.mrb[9].mxu1  ;;  %v499_v10 = vmax.f32 %v468_v7, 0.0 }
 0x110   : > { %1363 = vmatprep.subr.bf16.mxu1 %v1362_v5  ;;  %v500_v13 = vmax.f32 %v470_v8, 0.0 }
 0x111   : > { %1365 = vmatpush1.bf16.msra.mxu1 %v1364_v4 }
 0x112   : > { %v474_v9 = vpop.f32.mrb[10].mxu1 }
 0x113   : > { %v501_v11 = vmax.f32 %v474_v9, 0.0  ;;  %v476_v12 = vpop.f32.mrb[11].mxu1 }
 0x114   : > { %v502_v14 = vmax.f32 %v476_v12, 0.0  ;;  %v541_v12 = vpop.permute.xlu1 %540 }
 0x115   : > { %v1368_v15 = vpack.c.bf16 %v501_v11, %v499_v10 }
 0x116   : > { %v1366_v16 = vpack.c.bf16 %v502_v14, %v500_v13  ;;  %v480_v17 = vpop.f32.mrb[12].mxu1 }
 0x117   : > { %v482_v18 = vpop.f32.mrb[13].mxu1  ;;  %v503_v20 = vmax.f32 %v480_v17, 0.0 }
 0x118   : > { %1367 = vmatprep.subr.bf16.mxu1 %v1366_v16  ;;  %v504_v23 = vmax.f32 %v482_v18, 0.0  ;;  %v556_v18 = vpop.permute.xlu0 %555 }
 0x119   : > { %1369 = vmatpush1.bf16.msra.mxu1 %v1368_v15 }
 0x11a   : > { %v486_v19 = vpop.f32.mrb[14].mxu1 }
 0x11b   : > { %v505_v21 = vmax.f32 %v486_v19, 0.0  ;;  %v488_v22 = vpop.f32.mrb[15].mxu1 }
 0x11c   : > { %v506_v24 = vmax.f32 %v488_v22, 0.0 }
 0x11d   : > { %v1372_v26 = vpack.c.bf16 %v505_v21, %v503_v20 }
 0x11e   : > { %v1370_v27 = vpack.c.bf16 %v506_v24, %v504_v23 }
 0x120   : > { %1371 = vmatprep.subr.bf16.mxu1 %v1370_v27 }
 0x121   : > { %1373 = vmatpush1.bf16.msra.mxu1 %v1372_v26 }
 0x124   : > { %1323 = vmatmul.mubr.msk.f32.vlgmr.msra.gmra.mrb[16].mxu1 %vm563_vm2, %v507_v28 }
 0x125   : > { %658 = vmatprep.mubr.f32.mxu1 %v1539_v6 }
 0x128   : > { %1324 = vmatmul.mubr.msk.f32.gmra.mrb[18].mxu1 %vm563_vm2, %v508_v29 }
 0x129   : > { %664 = vmatprep.mubr.f32.mxu1 %v1539_v6 }
 0x12c   : > { %1325 = vmatmul.mubr.msk.f32.gmra.mrb[20].mxu1 %vm563_vm2, %v509_v30 }
 0x12d   : > { %670 = vmatprep.mubr.f32.mxu1 %v1539_v6 }
 0x130   : > { %1326 = vmatmul.mubr.msk.f32.gmra.mrb[22].mxu1 %vm563_vm2, %v510_v31 }
 0x131   : > { %676 = vmatprep.mubr.f32.mxu1 %v1539_v6 }
 0x134   : > { %1327 = vmatmul.mubr.msk.f32.gmra.mrb[24].mxu1 %vm563_vm2, %v511_v32 }
 0x135   : > { %682 = vmatprep.mubr.f32.mxu1 %v1539_v6 }
 0x138   : > { %1328 = vmatmul.mubr.msk.f32.gmra.mrb[26].mxu1 %vm563_vm2, %v512_v33 }
 0x139   : > { %688 = vmatprep.mubr.f32.mxu1 %v1539_v6 }
 0x13c   : > { %1329 = vmatmul.mubr.msk.f32.gmra.mrb[28].mxu1 %vm563_vm2, %v513_v34  ;;  %v561_v34 = vpop.permute.xlu1 %560 }
 0x13d   : > { %694 = vmatprep.mubr.f32.mxu1 %v1539_v6 }
 0x140   : > { %1330 = vmatmul.mubr.msk.f32.gmra.mrb[30].mxu1 %vm563_vm2, %v514_v35 }
 0x141   : > { %1183 = vmatprep.mubr.f32.mxu1 %v1539_v6 }
 0x1f7   : > { %v654_v37 = vpop.f32.mrb[16].mxu1 }
 0x1f8   : > { %v656_v39 = vpop.f32.mrb[17].mxu1  ;;  %v655_v56 = vadd.f32 %v654_v37, %v526_v44 }
 0x1f9   : > { %v657_v59 = vadd.f32 %v656_v39, %v526_v44 }
 0x1fa   : > { %v701_v0 = vmax.f32 %v655_v56, 0.0  ;;  %v747_v56 = vld [vmem:[%s1978_s5 + $0x10] sm:$0xff] }
 0x1fb   : > { %v660_v41 = vpop.f32.mrb[18].mxu1  ;;  %v702_v4 = vmax.f32 %v657_v59, 0.0  ;;  %v750_v59 = vld [vmem:[%s1978_s5 + $0x28] sm:$0xff] }
 0x1fc   : > { %v662_v42 = vpop.f32.mrb[19].mxu1  ;;  %v661_v1 = vadd.f32 %v660_v41, %v531_v52 }
 0x1fd   : > { %v663_v5 = vadd.f32 %v662_v42, %v531_v52 }
 0x1fe   : > { %v703_v15 = vmax.f32 %v661_v1, 0.0  ;;  %v757_v1 = vld [vmem:[%s1978_s5 + $0x60] sm:$0xff] }
 0x1ff   : > { %v666_v47 = vpop.f32.mrb[20].mxu1  ;;  %v704_v19 = vmax.f32 %v663_v5, 0.0 }
 0x200   : > { %v668_v48 = vpop.f32.mrb[21].mxu1  ;;  %v667_v16 = vadd.f32 %v666_v47, %v536_v62 }
 0x201   : > { %v669_v20 = vadd.f32 %v668_v48, %v536_v62  ;;  %v754_v62 = vld [vmem:[%s1978_s5 + $0x48] sm:$0xff] }
 0x202   : > { %v705_v30 = vmax.f32 %v667_v16, 0.0 }
 0x203   : > { %v672_v53 = vpop.f32.mrb[22].mxu1  ;;  %v706_v35 = vmax.f32 %v669_v20, 0.0 }
 0x204   : > { %v674_v54 = vpop.f32.mrb[23].mxu1  ;;  %v673_v31 = vadd.f32 %v672_v53, %v541_v12 }
 0x205   : > { %v675_v36 = vadd.f32 %v674_v54, %v541_v12  ;;  %v745_v54 = vld [vmem:[%s1978_s5] sm:$0xff] }
 0x206   : > { %v707_v46 = vmax.f32 %v673_v31, 0.0 }
 0x207   : > { %v678_v60 = vpop.f32.mrb[24].mxu1  ;;  %v708_v48 = vmax.f32 %v675_v36, 0.0 }
 0x208   : > { %v679_v25 = vadd.f32 %v678_v60, %v546_v50  ;;  %v680_v61 = vpop.f32.mrb[25].mxu1  ;;  %v751_v60 = vld [vmem:[%s1978_s5 + $0x30] sm:$0xff] }
 0x209   : > { %v681_v63 = vadd.f32 %v680_v61, %v546_v50  ;;  %v753_v61 = vld [vmem:[%s1978_s5 + $0x40] sm:$0xff] }
 0x20a   : > { %v709_v2 = vmax.f32 %v679_v25, 0.0  ;;  %v752_v25 = vld [vmem:[%s1978_s5 + $0x38] sm:$0xff] }
 0x20b   : > { %v710_v7 = vmax.f32 %v681_v63, 0.0  ;;  %v684_v8 = vpop.f32.mrb[26].mxu1  ;;  %v755_v63 = vld [vmem:[%s1978_s5 + $0x50] sm:$0xff] }
 0x20c   : > { %v685_v9 = vadd.f32 %v684_v8, %v551_v58  ;;  %v686_v10 = vpop.f32.mrb[27].mxu1  ;;  %v737_v11 = vsel %vm735_vm4, %v709_v2, %v701_v0  ;;  %v756_v0 = vld [vmem:[%s1978_s5 + $0x58] sm:$0xff]  ;;  %v758_v2 = vld [vmem:[%s1978_s5 + $0x68] sm:$0xff]  ;;  %v780_v8 = vpop.permute.xlu0 %779 }
 0x20d   : > { %v687_v13 = vadd.f32 %v686_v10, %v551_v58  ;;  %v738_v14 = vsel %vm1818_vm5, %v710_v7, %v702_v4  ;;  %v749_v58 = vld [vmem:[%s1978_s5 + $0x20] sm:$0xff]  ;;  %v760_v4 = vld [vmem:[%s1978_s5 + $0x78] sm:$0xff]  ;;  %v785_v10 = vpop.permute.xlu1 %784 }
 0x20e   : > { %v711_v17 = vmax.f32 %v685_v9, 0.0 }
 0x20f   : > { %v712_v21 = vmax.f32 %v687_v13, 0.0  ;;  %v690_v22 = vpop.f32.mrb[28].mxu1 }
 0x210   : > { %v691_v23 = vadd.f32 %v690_v22, %v556_v18  ;;  %v692_v24 = vpop.f32.mrb[29].mxu1  ;;  %v739_v26 = vsel %vm735_vm4, %v711_v17, %v703_v15 }
 0x211   : > { %v693_v27 = vadd.f32 %v692_v24, %v556_v18  ;;  %v740_v28 = vsel %vm1818_vm5, %v712_v21, %v704_v19  ;;  %v1376_v29 = vpack.c.bf16 %v739_v26, %v737_v11  ;;  %v795_v26 = vpop.permute.xlu1 %794 }
 0x212   : > { %v713_v32 = vmax.f32 %v691_v23, 0.0  ;;  %v1374_v33 = vpack.c.bf16 %v740_v28, %v738_v14  ;;  %v790_v23 = vpop.permute.xlu0 %789 }
 0x213   : > { %v714_v37 = vmax.f32 %v693_v27, 0.0  ;;  %v696_v38 = vpop.f32.mrb[30].mxu1 }
 0x214   : > { %v697_v39 = vadd.f32 %v696_v38, %v561_v34  ;;  %v698_v41 = vpop.f32.mrb[31].mxu1  ;;  %1375 = vmatprep.subr.bf16.mxu0 %v1374_v33  ;;  %v741_v42 = vsel %vm735_vm4, %v713_v32, %v705_v30 }
 0x215   : > { %v699_v43 = vadd.f32 %v698_v41, %v561_v34  ;;  %1377 = vmatpush1.bf16.msra.mxu0 %v1376_v29  ;;  %v742_v44 = vsel %vm1818_vm5, %v714_v37, %v706_v35 }
 0x216   : > { %v715_v47 = vmax.f32 %v697_v39, 0.0  ;;  %v800_v39 = vpop.permute.xlu0 %799 }
 0x217   : > { %v716_v49 = vmax.f32 %v699_v43, 0.0  ;;  %v805_v43 = vpop.permute.xlu1 %804 }
 0x218   : > { %v743_v50 = vsel %vm735_vm4, %v715_v47, %v707_v46 }
 0x219   : > { %v744_v51 = vsel %vm1818_vm5, %v716_v49, %v708_v48  ;;  %v1380_v52 = vpack.c.bf16 %v743_v50, %v741_v42 }
 0x21a   : > { %v1378_v53 = vpack.c.bf16 %v744_v51, %v742_v44 }
 0x21c   : > { %1379 = vmatprep.subr.bf16.mxu0 %v1378_v53 }
 0x21d   : > { %1381 = vmatpush1.bf16.msra.mxu0 %v1380_v52 }
 0x220   : > { %1331 = vmatmul.mubr.msk.f32.vlgmr.msra.gmra.mrb[0].mxu0 %vm857_vm6, %v745_v54 }
 0x221   : > { %976 = vmatprep.mubr.f32.mxu0 %v1539_v6 }
 0x224   : > { %1332 = vmatmul.mubr.msk.f32.gmra.mrb[2].mxu0 %vm857_vm6, %v746_v55 }
 0x225   : > { %982 = vmatprep.mubr.f32.mxu0 %v1539_v6 }
 0x228   : > { %1333 = vmatmul.mubr.msk.f32.gmra.mrb[4].mxu0 %vm857_vm6, %v747_v56 }
 0x229   : > { %988 = vmatprep.mubr.f32.mxu0 %v1539_v6 }
 0x22c   : > { %1334 = vmatmul.mubr.msk.f32.gmra.mrb[6].mxu0 %vm857_vm6, %v748_v57  ;;  %v810_v57 = vpop.permute.xlu0 %809 }
 0x22d   : > { %994 = vmatprep.mubr.f32.mxu0 %v1539_v6 }
 0x230   : > { %1335 = vmatmul.mubr.msk.f32.gmra.mrb[8].mxu0 %vm857_vm6, %v749_v58 }
 0x231   : > { %1000 = vmatprep.mubr.f32.mxu0 %v1539_v6 }
 0x234   : > { %1336 = vmatmul.mubr.msk.f32.gmra.mrb[10].mxu0 %vm857_vm6, %v750_v59 }
 0x235   : > { %1006 = vmatprep.mubr.f32.mxu0 %v1539_v6 }
 0x238   : > { %1337 = vmatmul.mubr.msk.f32.gmra.mrb[12].mxu0 %vm857_vm6, %v751_v60  ;;  %v815_v60 = vpop.permute.xlu1 %814 }
 0x239   : > { %1012 = vmatprep.mubr.f32.mxu0 %v1539_v6 }
 0x23c   : > { %1338 = vmatmul.mubr.msk.f32.gmra.mrb[14].mxu0 %vm857_vm6, %v752_v25 }
 0x23d   : > { %1018 = vmatprep.mubr.f32.mxu0 %v1539_v6 }
 0x240   : > { %1339 = vmatmul.mubr.msk.f32.gmra.mrb[16].mxu0 %vm857_vm6, %v753_v61 }
 0x241   : > { %1024 = vmatprep.mubr.f32.mxu0 %v1539_v6 }
 0x244   : > { %1340 = vmatmul.mubr.msk.f32.gmra.mrb[18].mxu0 %vm857_vm6, %v754_v62 }
 0x245   : > { %1030 = vmatprep.mubr.f32.mxu0 %v1539_v6 }
 0x248   : > { %1341 = vmatmul.mubr.msk.f32.gmra.mrb[20].mxu0 %vm857_vm6, %v755_v63 }
 0x249   : > { %1036 = vmatprep.mubr.f32.mxu0 %v1539_v6 }
 0x24c   : > { %1342 = vmatmul.mubr.msk.f32.gmra.mrb[22].mxu0 %vm857_vm6, %v756_v0 }
 0x24d   : > { %1042 = vmatprep.mubr.f32.mxu0 %v1539_v6 }
 0x250   : > { %1343 = vmatmul.mubr.msk.f32.gmra.mrb[24].mxu0 %vm857_vm6, %v757_v1 }
 0x251   : > { %1048 = vmatprep.mubr.f32.mxu0 %v1539_v6 }
 0x254   : > { %1344 = vmatmul.mubr.msk.f32.gmra.mrb[26].mxu0 %vm857_vm6, %v758_v2 }
 0x255   : > { %1054 = vmatprep.mubr.f32.mxu0 %v1539_v6 }
 0x258   : > { %1345 = vmatmul.mubr.msk.f32.gmra.mrb[28].mxu0 %vm857_vm6, %v759_v3 }
 0x259   : > { %1060 = vmatprep.mubr.f32.mxu0 %v1539_v6 }
 0x25c   : > { %1346 = vmatmul.mubr.msk.f32.gmra.mrb[30].mxu0 %vm857_vm6, %v760_v4 }
 0x25d   : > { %1177 = vmatprep.mubr.f32.mxu0 %v1539_v6 }
 0x2f3   : > { %v972_v5 = vpop.f32.mrb[0].mxu0 }
 0x2f4   : > { %v974_v7 = vpop.f32.mrb[1].mxu0  ;;  %v973_v9 = vadd.f32 %v972_v5, %v780_v8 }
 0x2f5   : > { %v975_v11 = vadd.f32 %v974_v7, %v780_v8 }
 0x2f6   : > { %v1067_v16 = vmax.f32 %v973_v9, 0.0  ;;  %v820_v9 = vpop.permute.xlu0 %819 }
 0x2f7   : > { %v978_v12 = vpop.f32.mrb[2].mxu0  ;;  %v1068_v18 = vmax.f32 %v975_v11, 0.0 }
 0x2f8   : > { %v979_v13 = vadd.f32 %v978_v12, %v785_v10  ;;  %v980_v14 = vpop.f32.mrb[3].mxu0  ;;  %v825_v12 = vpop.permute.xlu1 %824 }
 0x2f9   : > { %v981_v15 = vadd.f32 %v980_v14, %v785_v10 }
 0x2fa   : > { %v1069_v17 = vmax.f32 %v979_v13, 0.0 }
 0x2fb   : > { %v1070_v19 = vmax.f32 %v981_v15, 0.0  ;;  %v984_v20 = vpop.f32.mrb[4].mxu0 }
 0x2fc   : > { %v1384_v21 = vpack.c.bf16 %v1069_v17, %v1067_v16  ;;  %v986_v22 = vpop.f32.mrb[5].mxu0  ;;  %v985_v6 = vadd.f32 %v984_v20, %v790_v23 }
 0x2fd   : > { %v1382_v24 = vpack.c.bf16 %v1070_v19, %v1068_v18  ;;  %v987_v27 = vadd.f32 %v986_v22, %v790_v23 }
 0x2fe   : > { %v1071_v32 = vmax.f32 %v985_v6, 0.0  ;;  %v830_v6 = vpop.permute.xlu0 %829 }
 0x2ff   : > { %v990_v28 = vpop.f32.mrb[6].mxu0  ;;  %1383 = vmatprep.subr.bf16.mxu0 %v1382_v24  ;;  %1414 = vmatprep.subr.bf16.mxu1 %v1382_v24  ;;  %v1072_v34 = vmax.f32 %v987_v27, 0.0 }
 0x300   : > { %v991_v29 = vadd.f32 %v990_v28, %v795_v26  ;;  %v992_v30 = vpop.f32.mrb[7].mxu0  ;;  %1385 = vmatpush1.bf16.msra.mxu0 %v1384_v21  ;;  %1422 = vmatpush1.bf16.msra.mxu1 %v1384_v21  ;;  %v835_v28 = vpop.permute.xlu1 %834 }
 0x301   : > { %v993_v31 = vadd.f32 %v992_v30, %v795_v26 }
 0x302   : > { %v1073_v33 = vmax.f32 %v991_v29, 0.0 }
 0x303   : > { %v1074_v35 = vmax.f32 %v993_v31, 0.0  ;;  %v996_v36 = vpop.f32.mrb[8].mxu0 }
 0x304   : > { %v1388_v37 = vpack.c.bf16 %v1073_v33, %v1071_v32  ;;  %v998_v38 = vpop.f32.mrb[9].mxu0  ;;  %v997_v42 = vadd.f32 %v996_v36, %v800_v39 }
 0x305   : > { %v1386_v41 = vpack.c.bf16 %v1074_v35, %v1072_v34  ;;  %v999_v44 = vadd.f32 %v998_v38, %v800_v39 }
 0x306   : > { %v1075_v50 = vmax.f32 %v997_v42, 0.0  ;;  %v840_v42 = vpop.permute.xlu0 %839 }
 0x307   : > { %v1002_v46 = vpop.f32.mrb[10].mxu0  ;;  %1387 = vmatprep.subr.bf16.mxu0 %v1386_v41  ;;  %1415 = vmatprep.subr.bf16.mxu1 %v1386_v41  ;;  %v1076_v52 = vmax.f32 %v999_v44, 0.0 }
 0x308   : > { %v1003_v47 = vadd.f32 %v1002_v46, %v805_v43  ;;  %v1004_v48 = vpop.f32.mrb[11].mxu0  ;;  %1389 = vmatpush1.bf16.msra.mxu0 %v1388_v37  ;;  %1423 = vmatpush1.bf16.msra.mxu1 %v1388_v37  ;;  %v845_v46 = vpop.permute.xlu1 %844 }
 0x309   : > { %v1005_v49 = vadd.f32 %v1004_v48, %v805_v43 }
 0x30a   : > { %v1077_v51 = vmax.f32 %v1003_v47, 0.0 }
 0x30b   : > { %v1078_v53 = vmax.f32 %v1005_v49, 0.0  ;;  %v1008_v54 = vpop.f32.mrb[12].mxu0 }
 0x30c   : > { %v1392_v55 = vpack.c.bf16 %v1077_v51, %v1075_v50  ;;  %v1010_v56 = vpop.f32.mrb[13].mxu0  ;;  %v1009_v59 = vadd.f32 %v1008_v54, %v810_v57 }
 0x30d   : > { %v1390_v58 = vpack.c.bf16 %v1078_v53, %v1076_v52  ;;  %v1011_v25 = vadd.f32 %v1010_v56, %v810_v57 }
 0x30e   : > { %v1079_v1 = vmax.f32 %v1009_v59, 0.0  ;;  %v850_v59 = vpop.permute.xlu0 %849 }
 0x30f   : > { %v1014_v61 = vpop.f32.mrb[14].mxu0  ;;  %1391 = vmatprep.subr.bf16.mxu0 %v1390_v58  ;;  %1416 = vmatprep.subr.bf16.mxu1 %v1390_v58  ;;  %v1080_v3 = vmax.f32 %v1011_v25, 0.0 }
 0x310   : > { %v1015_v62 = vadd.f32 %v1014_v61, %v815_v60  ;;  %v1016_v63 = vpop.f32.mrb[15].mxu0  ;;  %1393 = vmatpush1.bf16.msra.mxu0 %v1392_v55  ;;  %1424 = vmatpush1.bf16.msra.mxu1 %v1392_v55  ;;  %v855_v61 = vpop.permute.xlu1 %854 }
 0x311   : > { %v1017_v0 = vadd.f32 %v1016_v63, %v815_v60 }
 0x312   : > { %v1081_v2 = vmax.f32 %v1015_v62, 0.0 }
 0x313   : > { %v1082_v4 = vmax.f32 %v1017_v0, 0.0  ;;  %v1020_v5 = vpop.f32.mrb[16].mxu0 }
 0x314   : > { %v1396_v7 = vpack.c.bf16 %v1081_v2, %v1079_v1  ;;  %v1022_v8 = vpop.f32.mrb[17].mxu0  ;;  %v1021_v11 = vadd.f32 %v1020_v5, %v820_v9 }
 0x315   : > { %v1394_v10 = vpack.c.bf16 %v1082_v4, %v1080_v3  ;;  %v1023_v13 = vadd.f32 %v1022_v8, %v820_v9 }
 0x316   : > { %v1083_v18 = vmax.f32 %v1021_v11, 0.0  ;;  %v1100_v11 = vld [vmem:[%s1979_s6 + $0x8] sm:$0xff] }
 0x317   : > { %v1026_v14 = vpop.f32.mrb[18].mxu0  ;;  %1395 = vmatprep.subr.bf16.mxu0 %v1394_v10  ;;  %1417 = vmatprep.subr.bf16.mxu1 %v1394_v10  ;;  %v1084_v20 = vmax.f32 %v1023_v13, 0.0  ;;  %v1099_v10 = vld [vmem:[%s1979_s6] sm:$0xff]  ;;  %v1196_v13 = vsub.s32 3, %v1809_v40 }
 0x318   : > { %v1027_v15 = vadd.f32 %v1026_v14, %v825_v12  ;;  %v1028_v16 = vpop.f32.mrb[19].mxu0  ;;  %1397 = vmatpush1.bf16.msra.mxu0 %v1396_v7  ;;  %1425 = vmatpush1.bf16.msra.mxu1 %v1396_v7 }
 0x319   : > { %v1029_v17 = vadd.f32 %v1028_v16, %v825_v12  ;;  %v1192_v12 = vsub.s32 1, %v1809_v40 }
 0x31a   : > { %v1085_v19 = vmax.f32 %v1027_v15, 0.0  ;;  %v1197_v15 = vrot.slane %v1813_v45, %v1196_v13 }
 0x31b   : > { %v1086_v21 = vmax.f32 %v1029_v17, 0.0  ;;  %v1032_v22 = vpop.f32.mrb[20].mxu0  ;;  %v1193_v14 = vrot.slane %v1813_v45, %v1192_v12 }
 0x31c   : > { %v1400_v23 = vpack.c.bf16 %v1085_v19, %v1083_v18  ;;  %v1034_v24 = vpop.f32.mrb[21].mxu0  ;;  %v1033_v27 = vadd.f32 %v1032_v22, %v830_v6  ;;  %v1205_v17 = vrot.slane %v1197_v15, %v1192_v12  ;;  %v1111_v18 = vpop.permute.xlu1 %1110 }
 0x31d   : > { %v1398_v26 = vpack.c.bf16 %v1086_v21, %v1084_v20  ;;  %v1035_v29 = vadd.f32 %v1034_v24, %v830_v6  ;;  %v1201_v16 = vrot.slane %v1193_v14, %v1192_v12  ;;  %v1106_v19 = vpop.permute.xlu0 %1105 }
 0x31e   : > { %v1087_v34 = vmax.f32 %v1033_v27, 0.0  ;;  %vm1207_vm8 = vcmp.eq.s32.totalorder %v1205_v17, 1 }
 0x31f   : > { %v1038_v30 = vpop.f32.mrb[22].mxu0  ;;  %1399 = vmatprep.subr.bf16.mxu0 %v1398_v26  ;;  %1418 = vmatprep.subr.bf16.mxu1 %v1398_v26  ;;  %v1088_v36 = vmax.f32 %v1035_v29, 0.0  ;;  %vm1206_vm7 = vcmp.eq.s32.totalorder %v1201_v16, 1 }
 0x320   : > { %v1039_v31 = vadd.f32 %v1038_v30, %v835_v28  ;;  %v1040_v32 = vpop.f32.mrb[23].mxu0  ;;  %1401 = vmatpush1.bf16.msra.mxu0 %v1400_v23  ;;  %1426 = vmatpush1.bf16.msra.mxu1 %v1400_v23 }
 0x321   : > { %v1041_v33 = vadd.f32 %v1040_v32, %v835_v28 }
 0x322   : > { %v1089_v35 = vmax.f32 %v1039_v31, 0.0 }
 0x323   : > { %v1090_v37 = vmax.f32 %v1041_v33, 0.0  ;;  %v1044_v38 = vpop.f32.mrb[24].mxu0 }
 0x324   : > { %v1404_v39 = vpack.c.bf16 %v1089_v35, %v1087_v34  ;;  %v1046_v41 = vpop.f32.mrb[25].mxu0  ;;  %v1045_v44 = vadd.f32 %v1044_v38, %v840_v42 }
 0x325   : > { %v1402_v43 = vpack.c.bf16 %v1090_v37, %v1088_v36  ;;  %v1047_v47 = vadd.f32 %v1046_v41, %v840_v42 }
 0x326   : > { %v1091_v52 = vmax.f32 %v1045_v44, 0.0 }
 0x327   : > { %v1050_v48 = vpop.f32.mrb[26].mxu0  ;;  %1403 = vmatprep.subr.bf16.mxu0 %v1402_v43  ;;  %1419 = vmatprep.subr.bf16.mxu1 %v1402_v43  ;;  %v1092_v54 = vmax.f32 %v1047_v47, 0.0 }
 0x328   : > { %v1051_v49 = vadd.f32 %v1050_v48, %v845_v46  ;;  %v1052_v50 = vpop.f32.mrb[27].mxu0  ;;  %1405 = vmatpush1.bf16.msra.mxu0 %v1404_v39  ;;  %1427 = vmatpush1.bf16.msra.mxu1 %v1404_v39 }
 0x329   : > { %v1053_v51 = vadd.f32 %v1052_v50, %v845_v46 }
 0x32a   : > { %v1093_v53 = vmax.f32 %v1051_v49, 0.0 }
 0x32b   : > { %v1094_v55 = vmax.f32 %v1053_v51, 0.0  ;;  %v1056_v56 = vpop.f32.mrb[28].mxu0 }
 0x32c   : > { %v1408_v57 = vpack.c.bf16 %v1093_v53, %v1091_v52  ;;  %v1058_v58 = vpop.f32.mrb[29].mxu0  ;;  %v1057_v25 = vadd.f32 %v1056_v56, %v850_v59 }
 0x32d   : > { %v1406_v60 = vpack.c.bf16 %v1094_v55, %v1092_v54  ;;  %v1059_v62 = vadd.f32 %v1058_v58, %v850_v59 }
 0x32e   : > { %v1095_v3 = vmax.f32 %v1057_v25, 0.0 }
 0x32f   : > { %v1062_v63 = vpop.f32.mrb[30].mxu0  ;;  %1407 = vmatprep.subr.bf16.mxu0 %v1406_v60  ;;  %1420 = vmatprep.subr.bf16.mxu1 %v1406_v60  ;;  %v1096_v5 = vmax.f32 %v1059_v62, 0.0 }
 0x330   : > { %v1063_v0 = vadd.f32 %v1062_v63, %v855_v61  ;;  %v1064_v1 = vpop.f32.mrb[31].mxu0  ;;  %1409 = vmatpush1.bf16.msra.mxu0 %v1408_v57  ;;  %1428 = vmatpush1.bf16.msra.mxu1 %v1408_v57 }
 0x331   : > { %v1065_v2 = vadd.f32 %v1064_v1, %v855_v61 }
 0x332   : > { %v1097_v4 = vmax.f32 %v1063_v0, 0.0 }
 0x333   : > { %v1098_v7 = vmax.f32 %v1065_v2, 0.0 }
 0x334   : > { %v1412_v8 = vpack.c.bf16 %v1097_v4, %v1095_v3 }
 0x335   : > { %v1410_v9 = vpack.c.bf16 %v1098_v7, %v1096_v5 }
 0x337   : > { %1411 = vmatprep.subr.bf16.mxu0 %v1410_v9  ;;  %1421 = vmatprep.subr.bf16.mxu1 %v1410_v9 }
 0x338   : > { %1413 = vmatpush1.bf16.msra.mxu0 %v1412_v8  ;;  %1429 = vmatpush1.bf16.msra.mxu1 %v1412_v8 }
 0x33b   : > { %1178 = vmatmul.mubr.f32.vlgmr.msra.gmra.mrb[32].mxu0 %v1099_v10  ;;  %1184 = vmatmul.mubr.f32.vlgmr.msra.gmra.mrb[32].mxu1 %v1100_v11 }
 0x40e   : > { %v1179_v20 = vpop.f32.mrb[32].mxu0  ;;  %v1185_v21 = vpop.f32.mrb[32].mxu1 }
 0x40f   : > { %v1180_v22 = vadd.f32 %v1179_v20, %v1106_v19  ;;  %v1186_v23 = vadd.f32 %v1185_v21, %v1111_v18  ;;  %v1181_v40 = vpop.f32.mrb[33].mxu0  ;;  %v1187_v24 = vpop.f32.mrb[33].mxu1 }
 0x410   : > { %v1182_v6 = vadd.f32 %v1181_v40, %v1106_v19  ;;  %v1188_v45 = vadd.f32 %v1187_v24, %v1111_v18 }
 0x411   : > { %v1208_v26 = vsel %vm1206_vm7, %v1186_v23, %v1180_v22 }
 0x412   : > { %v1209_v27 = vsel %vm1207_vm8, %v1188_v45, %v1182_v6  ;;  %1210 = vst [vmem:[%s322_s19] sm:$0xff] %v1208_v26 }
 0x413   : > { %1211 = vst [vmem:[%s322_s19 + $0x8] sm:$0xff] %v1209_v27 }
 0x414   : > { %1488 = shalt.err (!%p1485_p7)
}
 0x415   : > { %s1489_s20 = scalar_lea.hbm %s1929_s29, 256  ;;  %s1493_s17 = scalar_lea.hbm %s1980_s7, 512 }
 0x416   : > { %p1490_p10 = scmp.ne.s32.totalorder %s1929_s29, %s1489_s20  ;;  %p1494_p13 = scmp.lt.u32.totalorder %s1929_s29, %s1980_s7 }
 0x417   : > { %p1495_p0 = scmp.lt.u32.totalorder %s1493_s17, %s1489_s20  ;;  %p1497_p2 = scmp.lt.u32.totalorder %s1489_s20, %s1929_s29 }
 0x418   : > { %p1491_p11 = pnand %p1490_p10, %p1621_p6 }
 0x419   : > { %p1496_p1 = por %p1495_p0, %p1494_p13 }
 0x41a   : > { %p1492_p12 = pneg %p1491_p11 }
 0x41b   : > { %p1498_p3 = por %p1497_p2, %p1496_p1 }
 0x41d   : > { %p1499_p4 = pnand %p1498_p3, %p1492_p12 }
 0x41f   : > { %1502 = shalt.err (!%p1499_p4)
}
 0x420   : > { %1432 = dma.vmem_to_hbm [thread:$0]  (%p1621_p6), %s1931_s21, 256, %s1929_s29, %s1213_s28  }
 0x421 PF: > { %s1239_s22 = sand.u32 1, %s1525_s24   ;;  %p1435_p5 = pnand %p1306_p9, %p1625_p8 }
 0x422   : > { %s1240_s23 = scalar_lea.sflag [#allocation4], %s1239_s22 }
 0x423   : > { %1520 = dma.done.wait (!%p1435_p5), %s1240_s23, 256  }
 0x424   : > { %1522 = vsyncadd (!%p1435_p5), %s1240_s23, 4294967040  ;;  %p17_p7 = scmp.ge.s32.totalorder %s1607_s30, 4   ;;  %s1985_s24 = smov %s1529_s25 }
 0x425   : > { %s1986_s25 = smov %s1533_s26  ;;  %s1987_s26 = smov %s1619_s10 }
 0x426   : > { %s1988_s27 = smov %s1607_s30  ;;  %19 = sbr.rel (!%p17_p7) target bundleno = 3 (0x3), region = 114 }
 0x42d   :  { %1245 = vsyncpa [#allocation4], 1 }
 0x42e   :  { %1247 = vsyncpa [#allocation4 + $0x1], 1 }

</bundles_post_ra>
